<compile_context>
chip_gen: v7x
topology: tpu7x:2x2x1
jax: 0.10.0
libtpu: 0.0.40
codegen_flags: <defaults>
</compile_context>

<pallas_src>
import functools

import jax
import jax.numpy as jnp
from jax.experimental import pallas as pl
from jax.experimental.pallas import tpu as pltpu

EPS = 1e-5


def _round_up(n, m):
    return ((n + m - 1) // m) * m


def dqn_kernel(x_ref, w_ref, vec_ref, out_ref, *, true_b):
    """Whole forward pass; all operands resident in VMEM.

    x_ref:   (Bp, P)   mm_dtype (batch padded to sublane tile, features to P)
    w_ref:   (5, P, P) mm_dtype  [w1, w2, w3, w4, w_head], each zero-padded
    vec_ref: (16, P)   f32  rows: [b1,g1,be1, b2,g2,be2, b3,g3,be3, b4,g4,be4,
                                   b_head, 0, 0, 0]
    out_ref: (Bp, P)   f32  (valid block is [:true_b, :outputs])
    """
    mm_dtype = w_ref.dtype
    bp = x_ref.shape[0]
    inv_b = 1.0 / true_b                         # true batch size, static
    need_mask = bp > true_b
    if need_mask:
        row_id = jax.lax.broadcasted_iota(jnp.int32, (bp, 1), 0)
        row_mask = row_id < true_b

    def linear(h_mm, widx, row):
        # MXU matmul with f32 accumulation + f32 bias add.
        b = vec_ref[row:row + 1, :]
        return jnp.dot(h_mm, w_ref[widx],
                       preferred_element_type=jnp.float32) + b

    def relu_bn(z, row):
        z = jnp.maximum(z, 0.0)                  # VPU
        # Exclude padded batch rows from the moments; biased variance as in
        # training-mode BatchNorm1d.  One-pass moments (sum z, sum z*z).
        zm = jnp.where(row_mask, z, 0.0) if need_mask else z
        mean = jnp.sum(zm, axis=0, keepdims=True) * inv_b
        ez2 = jnp.sum(zm * zm, axis=0, keepdims=True) * inv_b
        var = jnp.maximum(ez2 - mean * mean, 0.0)
        g = vec_ref[row + 1:row + 2, :]
        be = vec_ref[row + 2:row + 3, :]
        # Fused affine: single broadcasted scale/shift pass over (Bp, P).
        # Padded columns have gamma = 0 -> output exactly 0 there.
        scale = g * jax.lax.rsqrt(var + EPS)
        shift = be - mean * scale
        return z * scale + shift

    # x is already mm_dtype (cast in the wrapper); hidden activations are f32
    # after BN and are cast per layer for the MXU.
    h = relu_bn(linear(x_ref[...], 0, 0), 0)
    h = relu_bn(linear(h.astype(mm_dtype), 1, 3), 3)
    h = relu_bn(linear(h.astype(mm_dtype), 2, 6), 6)
    h = relu_bn(linear(h.astype(mm_dtype), 3, 9), 9)
    # Head: lane-dense (Bp, P) store; padded rows/columns are garbage-free
    # (padded cols exactly zero) and sliced off in the wrapper.
    out_ref[...] = linear(h.astype(mm_dtype), 4, 12)


@functools.partial(jax.jit, static_argnames=("outputs", "use_bf16"))
def deep_fc_norm_dqn(x, params, *, outputs, use_bf16=True):
    """params = flat tuple from init_params (unpadded, weights as (in, out))."""
    (w1, b1, g1, be1,
     w2, b2, g2, be2,
     w3, b3, g3, be3,
     w4, b4, g4, be4,
     wh, bh) = params

    B, F = x.shape
    H = w1.shape[1]
    O = wh.shape[1]

    # One uniform lane width for every feature dimension.  Zero padding of
    # weights / biases / gamma / beta keeps padded columns exactly zero
    # through all layers, so the kernel never slices along features.
    P = max(_round_up(F, 128), _round_up(H, 128), _round_up(O, 128))

    # bf16 matmul operands are faster on all generations (f32 MXU matmuls are
    # decomposed into multiple bf16 passes); accumulation stays f32.
    mm_dtype = jnp.bfloat16 if use_bf16 else jnp.float32
    sublane = 16 if use_bf16 else 8
    Bp = _round_up(B, sublane)

    def pad_w(w):
        w = w.astype(jnp.float32)
        w = jnp.pad(w, ((0, P - w.shape[0]), (0, P - w.shape[1])))
        return w.astype(mm_dtype)

    def pad_vec(v):
        v = v.reshape(1, -1).astype(jnp.float32)
        return jnp.pad(v, ((0, 0), (0, P - v.shape[1])))

    # Batch padded to the sublane tile (masked out of BN stats in-kernel);
    # features padded to P.
    xp = jnp.pad(x.astype(jnp.float32),
                 ((0, Bp - B), (0, P - F))).astype(mm_dtype)
    wstack = jnp.stack([pad_w(w1), pad_w(w2), pad_w(w3), pad_w(w4), pad_w(wh)])

    vec_rows = [b1, g1, be1, b2, g2, be2, b3, g3, be3, b4, g4, be4, bh]
    vecs = jnp.concatenate(
        [pad_vec(v) for v in vec_rows]
        + [jnp.zeros((16 - len(vec_rows), P), jnp.float32)], axis=0)

    operands = (xp, wstack, vecs)

    # VMEM budget: 2x the actual working set, floored at 32 MiB, capped at
    # ~80% of this generation's physical VMEM (64 MiB fallback == v7x).
    param_bytes = sum(int(a.size) * a.dtype.itemsize for a in operands)
    act_bytes = 4 * Bp * P * 8          # a handful of live f32 (Bp, P) slabs
    try:
        vmem_cap = int(pltpu.get_tpu_info().vmem_capacity_bytes)
    except Exception:
        vmem_cap = 64 << 20
    cap = (vmem_cap * 4) // 5
    vmem_limit = int(min(max(2 * (param_bytes + act_bytes), 32 << 20), cap))

    vspec = pl.BlockSpec(memory_space=pltpu.MemorySpace.VMEM)
    out = pl.pallas_call(
        functools.partial(dqn_kernel, true_b=B),
        out_shape=jax.ShapeDtypeStruct((Bp, P), jnp.float32),
        in_specs=[vspec] * len(operands),
        out_specs=vspec,
        compiler_params=pltpu.CompilerParams(vmem_limit_bytes=vmem_limit),
    )(*operands)
    return out[:B, :outputs]


def init_params(key, input_shape, outputs, hidden):
    """PyTorch-style uniform(-1/sqrt(fan_in), 1/sqrt(fan_in)) init.

    Linear weights returned transposed to (in, out); per-feature vectors
    (bias, gamma, beta) as (1, F).
    """
    def linear(k, fan_in, fan_out):
        k_w, k_b = jax.random.split(k)
        bound = 1.0 / jnp.sqrt(float(fan_in))
        w = jax.random.uniform(k_w, (fan_in, fan_out), jnp.float32, -bound, bound)
        b = jax.random.uniform(k_b, (1, fan_out), jnp.float32, -bound, bound)
        return w, b

    def bn(f):
        return jnp.ones((1, f), jnp.float32), jnp.zeros((1, f), jnp.float32)

    ks = jax.random.split(key, 5)
    w1, b1 = linear(ks[0], input_shape, hidden)
    w2, b2 = linear(ks[1], hidden, hidden)
    w3, b3 = linear(ks[2], hidden, hidden)
    w4, b4 = linear(ks[3], hidden, hidden)
    wh, bh = linear(ks[4], hidden, outputs)
    g1, be1 = bn(hidden)
    g2, be2 = bn(hidden)
    g3, be3 = bn(hidden)
    g4, be4 = bn(hidden)
    return (w1, b1, g1, be1,
            w2, b2, g2, be2,
            w3, b3, g3, be3,
            w4, b4, g4, be4,
            wh, bh)


def reference_forward(x, params):
    """Pure-JAX reference mirroring the PyTorch forward (training-mode BN)."""
    (w1, b1, g1, be1, w2, b2, g2, be2,
     w3, b3, g3, be3, w4, b4, g4, be4, wh, bh) = params

    def block(h, w, b, g, be):
        z = jnp.maximum(h @ w + b, 0.0)
        m = z.mean(axis=0, keepdims=True)
        v = ((z - m) ** 2).mean(axis=0, keepdims=True)
        return (z - m) / jnp.sqrt(v + EPS) * g + be

    h = block(x, w1, b1, g1, be1)
    h = block(h, w2, b2, g2, be2)
    h = block(h, w3, b3, g3, be3)
    h = block(h, w4, b4, g4, be4)
    return h @ wh + bh


if __name__ == "__main__":
    # Small shapes consistent with the module (hidden = PyTorch default 64).
    # B = 6 is deliberately NOT a sublane multiple so the in-kernel BN row
    # mask is exercised on both the f32 (Bp=8) and bf16 (Bp=16) paths.
    B, INPUT, HIDDEN, OUTPUTS = 6, 32, 64, 8

    key = jax.random.PRNGKey(0)
    k_x, k_p = jax.random.split(key)
    x = jax.random.normal(k_x, (B, INPUT), jnp.float32)
    params = init_params(k_p, INPUT, OUTPUTS, HIDDEN)

    ref = reference_forward(x, params)

    # f32 matmul path: must match the pure-JAX reference closely (also
    # validates the padded-row BN masking exactly).
    out_f32 = jax.block_until_ready(
        deep_fc_norm_dqn(x, params, outputs=OUTPUTS, use_bf16=False))
    assert out_f32.shape == (B, OUTPUTS)
    assert jnp.allclose(out_f32, ref, atol=1e-3, rtol=1e-3), \
        "f32 kernel mismatch vs JAX reference"

    # Default bf16 matmul path (full-rate MXU on all generations).  BN at a
    # tiny batch amplifies bf16 noise, so check loosely + finiteness.
    out_bf16 = jax.block_until_ready(
        deep_fc_norm_dqn(x, params, outputs=OUTPUTS))
    assert out_bf16.shape == (B, OUTPUTS)
    assert bool(jnp.isfinite(out_bf16).all()), "bf16 path produced non-finite"
    assert float(jnp.max(jnp.abs(out_bf16 - ref))) < 0.5, \
        "bf16 kernel deviates too far from JAX reference"

    print("KERNEL_OK")
</pallas_src>

<mosaic_0001>
module attributes {stable_mosaic.version = 11 : i64} {
  func.func @dqn_kernel(%arg0: memref<8x128xf32, #tpu.memory_space<vmem>>, %arg1: memref<5x128x128xf32, #tpu.memory_space<vmem>>, %arg2: memref<16x128xf32, #tpu.memory_space<vmem>>, %arg3: memref<8x128xf32, #tpu.memory_space<vmem>>) attributes {dimension_semantics = [], scalar_prefetch = 0 : i64, scratch_operands = 0 : i64, tpu.core_type = #tpu.core_type<tc>} {
    %0 = tpu.iota {dimensions = array<i32: 0>} : vector<8x1xi32>
    %c6_i32 = arith.constant 6 : i32
    %1 = vector.broadcast %c6_i32 : i32 to vector<8x1xi32>
    %2 = arith.cmpi slt, %0, %1 : vector<8x1xi32>
    %c0 = arith.constant 0 : index
    %c0_0 = arith.constant 0 : index
    %3 = vector.load %arg0[%c0, %c0_0] : memref<8x128xf32, #tpu.memory_space<vmem>>, vector<8x128xf32>
    %c0_1 = arith.constant 0 : index
    %c0_2 = arith.constant 0 : index
    %4 = vector.load %arg2[%c0_1, %c0_2] : memref<16x128xf32, #tpu.memory_space<vmem>>, vector<1x128xf32>
    %c0_3 = arith.constant 0 : index
    %c0_4 = arith.constant 0 : index
    %c0_5 = arith.constant 0 : index
    %5 = vector.load %arg1[%c0_3, %c0_4, %c0_5] : memref<5x128x128xf32, #tpu.memory_space<vmem>>, vector<1x128x128xf32>
    %6 = vector.shape_cast %5 : vector<1x128x128xf32> to vector<128x128xf32>
    %cst = arith.constant dense<0.000000e+00> : vector<8x128xf32>
    %7 = tpu.matmul %3, %6, %cst {dimension_numbers = #tpu.dot_dimension_numbers<[1], [0], [0], [1], [0, 0, 1, 1], [], []>} : vector<8x128xf32>, vector<128x128xf32>, vector<8x128xf32> -> vector<8x128xf32>
    %8 = vector.broadcast %4 : vector<1x128xf32> to vector<8x128xf32>
    %9 = arith.addf %7, %8 : vector<8x128xf32>
    %cst_6 = arith.constant 0.000000e+00 : f32
    %10 = vector.broadcast %cst_6 : f32 to vector<8x128xf32>
    %11 = arith.maximumf %9, %10 : vector<8x128xf32>
    %cst_7 = arith.constant 0.000000e+00 : f32
    %12 = vector.shape_cast %2 : vector<8x1xi1> to vector<8x1xi1>
    %13 = vector.broadcast %12 : vector<8x1xi1> to vector<8x128xi1>
    %14 = vector.broadcast %cst_7 : f32 to vector<8x128xf32>
    %15 = arith.select %13, %11, %14 : vector<8x128xi1>, vector<8x128xf32>
    %cst_8 = arith.constant dense<0.000000e+00> : vector<128xf32>
    %16 = vector.multi_reduction <add>, %15, %cst_8 [0] : vector<8x128xf32> to vector<128xf32>
    %17 = vector.shape_cast %16 : vector<128xf32> to vector<1x128xf32>
    %cst_9 = arith.constant 0.166666672 : f32
    %18 = vector.broadcast %cst_9 : f32 to vector<1x128xf32>
    %19 = arith.mulf %17, %18 : vector<1x128xf32>
    %20 = arith.mulf %15, %15 : vector<8x128xf32>
    %cst_10 = arith.constant dense<0.000000e+00> : vector<128xf32>
    %21 = vector.multi_reduction <add>, %20, %cst_10 [0] : vector<8x128xf32> to vector<128xf32>
    %22 = vector.shape_cast %21 : vector<128xf32> to vector<1x128xf32>
    %cst_11 = arith.constant 0.166666672 : f32
    %23 = vector.broadcast %cst_11 : f32 to vector<1x128xf32>
    %24 = arith.mulf %22, %23 : vector<1x128xf32>
    %25 = arith.mulf %19, %19 : vector<1x128xf32>
    %26 = arith.subf %24, %25 : vector<1x128xf32>
    %cst_12 = arith.constant 0.000000e+00 : f32
    %27 = vector.broadcast %cst_12 : f32 to vector<1x128xf32>
    %28 = arith.maximumf %26, %27 : vector<1x128xf32>
    %c1 = arith.constant 1 : index
    %c0_13 = arith.constant 0 : index
    %29 = vector.load %arg2[%c1, %c0_13] : memref<16x128xf32, #tpu.memory_space<vmem>>, vector<1x128xf32>
    %c2 = arith.constant 2 : index
    %c0_14 = arith.constant 0 : index
    %30 = vector.load %arg2[%c2, %c0_14] : memref<16x128xf32, #tpu.memory_space<vmem>>, vector<1x128xf32>
    %cst_15 = arith.constant 9.99999974E-6 : f32
    %31 = vector.broadcast %cst_15 : f32 to vector<1x128xf32>
    %32 = arith.addf %28, %31 : vector<1x128xf32>
    %33 = math.rsqrt %32 : vector<1x128xf32>
    %34 = arith.mulf %29, %33 : vector<1x128xf32>
    %35 = arith.mulf %19, %34 : vector<1x128xf32>
    %36 = arith.subf %30, %35 : vector<1x128xf32>
    %37 = vector.broadcast %34 : vector<1x128xf32> to vector<8x128xf32>
    %38 = arith.mulf %11, %37 : vector<8x128xf32>
    %39 = vector.broadcast %36 : vector<1x128xf32> to vector<8x128xf32>
    %40 = arith.addf %38, %39 : vector<8x128xf32>
    %c3 = arith.constant 3 : index
    %c0_16 = arith.constant 0 : index
    %41 = vector.load %arg2[%c3, %c0_16] : memref<16x128xf32, #tpu.memory_space<vmem>>, vector<1x128xf32>
    %c1_17 = arith.constant 1 : index
    %c0_18 = arith.constant 0 : index
    %c0_19 = arith.constant 0 : index
    %42 = vector.load %arg1[%c1_17, %c0_18, %c0_19] : memref<5x128x128xf32, #tpu.memory_space<vmem>>, vector<1x128x128xf32>
    %43 = vector.shape_cast %42 : vector<1x128x128xf32> to vector<128x128xf32>
    %cst_20 = arith.constant dense<0.000000e+00> : vector<8x128xf32>
    %44 = tpu.matmul %40, %43, %cst_20 {dimension_numbers = #tpu.dot_dimension_numbers<[1], [0], [0], [1], [0, 0, 1, 1], [], []>} : vector<8x128xf32>, vector<128x128xf32>, vector<8x128xf32> -> vector<8x128xf32>
    %45 = vector.broadcast %41 : vector<1x128xf32> to vector<8x128xf32>
    %46 = arith.addf %44, %45 : vector<8x128xf32>
    %cst_21 = arith.constant 0.000000e+00 : f32
    %47 = vector.broadcast %cst_21 : f32 to vector<8x128xf32>
    %48 = arith.maximumf %46, %47 : vector<8x128xf32>
    %cst_22 = arith.constant 0.000000e+00 : f32
    %49 = vector.shape_cast %2 : vector<8x1xi1> to vector<8x1xi1>
    %50 = vector.broadcast %49 : vector<8x1xi1> to vector<8x128xi1>
    %51 = vector.broadcast %cst_22 : f32 to vector<8x128xf32>
    %52 = arith.select %50, %48, %51 : vector<8x128xi1>, vector<8x128xf32>
    %cst_23 = arith.constant dense<0.000000e+00> : vector<128xf32>
    %53 = vector.multi_reduction <add>, %52, %cst_23 [0] : vector<8x128xf32> to vector<128xf32>
    %54 = vector.shape_cast %53 : vector<128xf32> to vector<1x128xf32>
    %cst_24 = arith.constant 0.166666672 : f32
    %55 = vector.broadcast %cst_24 : f32 to vector<1x128xf32>
    %56 = arith.mulf %54, %55 : vector<1x128xf32>
    %57 = arith.mulf %52, %52 : vector<8x128xf32>
    %cst_25 = arith.constant dense<0.000000e+00> : vector<128xf32>
    %58 = vector.multi_reduction <add>, %57, %cst_25 [0] : vector<8x128xf32> to vector<128xf32>
    %59 = vector.shape_cast %58 : vector<128xf32> to vector<1x128xf32>
    %cst_26 = arith.constant 0.166666672 : f32
    %60 = vector.broadcast %cst_26 : f32 to vector<1x128xf32>
    %61 = arith.mulf %59, %60 : vector<1x128xf32>
    %62 = arith.mulf %56, %56 : vector<1x128xf32>
    %63 = arith.subf %61, %62 : vector<1x128xf32>
    %cst_27 = arith.constant 0.000000e+00 : f32
    %64 = vector.broadcast %cst_27 : f32 to vector<1x128xf32>
    %65 = arith.maximumf %63, %64 : vector<1x128xf32>
    %c4 = arith.constant 4 : index
    %c0_28 = arith.constant 0 : index
    %66 = vector.load %arg2[%c4, %c0_28] : memref<16x128xf32, #tpu.memory_space<vmem>>, vector<1x128xf32>
    %c5 = arith.constant 5 : index
    %c0_29 = arith.constant 0 : index
    %67 = vector.load %arg2[%c5, %c0_29] : memref<16x128xf32, #tpu.memory_space<vmem>>, vector<1x128xf32>
    %cst_30 = arith.constant 9.99999974E-6 : f32
    %68 = vector.broadcast %cst_30 : f32 to vector<1x128xf32>
    %69 = arith.addf %65, %68 : vector<1x128xf32>
    %70 = math.rsqrt %69 : vector<1x128xf32>
    %71 = arith.mulf %66, %70 : vector<1x128xf32>
    %72 = arith.mulf %56, %71 : vector<1x128xf32>
    %73 = arith.subf %67, %72 : vector<1x128xf32>
    %74 = vector.broadcast %71 : vector<1x128xf32> to vector<8x128xf32>
    %75 = arith.mulf %48, %74 : vector<8x128xf32>
    %76 = vector.broadcast %73 : vector<1x128xf32> to vector<8x128xf32>
    %77 = arith.addf %75, %76 : vector<8x128xf32>
    %c6 = arith.constant 6 : index
    %c0_31 = arith.constant 0 : index
    %78 = vector.load %arg2[%c6, %c0_31] : memref<16x128xf32, #tpu.memory_space<vmem>>, vector<1x128xf32>
    %c2_32 = arith.constant 2 : index
    %c0_33 = arith.constant 0 : index
    %c0_34 = arith.constant 0 : index
    %79 = vector.load %arg1[%c2_32, %c0_33, %c0_34] : memref<5x128x128xf32, #tpu.memory_space<vmem>>, vector<1x128x128xf32>
    %80 = vector.shape_cast %79 : vector<1x128x128xf32> to vector<128x128xf32>
    %cst_35 = arith.constant dense<0.000000e+00> : vector<8x128xf32>
    %81 = tpu.matmul %77, %80, %cst_35 {dimension_numbers = #tpu.dot_dimension_numbers<[1], [0], [0], [1], [0, 0, 1, 1], [], []>} : vector<8x128xf32>, vector<128x128xf32>, vector<8x128xf32> -> vector<8x128xf32>
    %82 = vector.broadcast %78 : vector<1x128xf32> to vector<8x128xf32>
    %83 = arith.addf %81, %82 : vector<8x128xf32>
    %cst_36 = arith.constant 0.000000e+00 : f32
    %84 = vector.broadcast %cst_36 : f32 to vector<8x128xf32>
    %85 = arith.maximumf %83, %84 : vector<8x128xf32>
    %cst_37 = arith.constant 0.000000e+00 : f32
    %86 = vector.shape_cast %2 : vector<8x1xi1> to vector<8x1xi1>
    %87 = vector.broadcast %86 : vector<8x1xi1> to vector<8x128xi1>
    %88 = vector.broadcast %cst_37 : f32 to vector<8x128xf32>
    %89 = arith.select %87, %85, %88 : vector<8x128xi1>, vector<8x128xf32>
    %cst_38 = arith.constant dense<0.000000e+00> : vector<128xf32>
    %90 = vector.multi_reduction <add>, %89, %cst_38 [0] : vector<8x128xf32> to vector<128xf32>
    %91 = vector.shape_cast %90 : vector<128xf32> to vector<1x128xf32>
    %cst_39 = arith.constant 0.166666672 : f32
    %92 = vector.broadcast %cst_39 : f32 to vector<1x128xf32>
    %93 = arith.mulf %91, %92 : vector<1x128xf32>
    %94 = arith.mulf %89, %89 : vector<8x128xf32>
    %cst_40 = arith.constant dense<0.000000e+00> : vector<128xf32>
    %95 = vector.multi_reduction <add>, %94, %cst_40 [0] : vector<8x128xf32> to vector<128xf32>
    %96 = vector.shape_cast %95 : vector<128xf32> to vector<1x128xf32>
    %cst_41 = arith.constant 0.166666672 : f32
    %97 = vector.broadcast %cst_41 : f32 to vector<1x128xf32>
    %98 = arith.mulf %96, %97 : vector<1x128xf32>
    %99 = arith.mulf %93, %93 : vector<1x128xf32>
    %100 = arith.subf %98, %99 : vector<1x128xf32>
    %cst_42 = arith.constant 0.000000e+00 : f32
    %101 = vector.broadcast %cst_42 : f32 to vector<1x128xf32>
    %102 = arith.maximumf %100, %101 : vector<1x128xf32>
    %c7 = arith.constant 7 : index
    %c0_43 = arith.constant 0 : index
    %103 = vector.load %arg2[%c7, %c0_43] : memref<16x128xf32, #tpu.memory_space<vmem>>, vector<1x128xf32>
    %c8 = arith.constant 8 : index
    %c0_44 = arith.constant 0 : index
    %104 = vector.load %arg2[%c8, %c0_44] : memref<16x128xf32, #tpu.memory_space<vmem>>, vector<1x128xf32>
    %cst_45 = arith.constant 9.99999974E-6 : f32
    %105 = vector.broadcast %cst_45 : f32 to vector<1x128xf32>
    %106 = arith.addf %102, %105 : vector<1x128xf32>
    %107 = math.rsqrt %106 : vector<1x128xf32>
    %108 = arith.mulf %103, %107 : vector<1x128xf32>
    %109 = arith.mulf %93, %108 : vector<1x128xf32>
    %110 = arith.subf %104, %109 : vector<1x128xf32>
    %111 = vector.broadcast %108 : vector<1x128xf32> to vector<8x128xf32>
    %112 = arith.mulf %85, %111 : vector<8x128xf32>
    %113 = vector.broadcast %110 : vector<1x128xf32> to vector<8x128xf32>
    %114 = arith.addf %112, %113 : vector<8x128xf32>
    %c9 = arith.constant 9 : index
    %c0_46 = arith.constant 0 : index
    %115 = vector.load %arg2[%c9, %c0_46] : memref<16x128xf32, #tpu.memory_space<vmem>>, vector<1x128xf32>
    %c3_47 = arith.constant 3 : index
    %c0_48 = arith.constant 0 : index
    %c0_49 = arith.constant 0 : index
    %116 = vector.load %arg1[%c3_47, %c0_48, %c0_49] : memref<5x128x128xf32, #tpu.memory_space<vmem>>, vector<1x128x128xf32>
    %117 = vector.shape_cast %116 : vector<1x128x128xf32> to vector<128x128xf32>
    %cst_50 = arith.constant dense<0.000000e+00> : vector<8x128xf32>
    %118 = tpu.matmul %114, %117, %cst_50 {dimension_numbers = #tpu.dot_dimension_numbers<[1], [0], [0], [1], [0, 0, 1, 1], [], []>} : vector<8x128xf32>, vector<128x128xf32>, vector<8x128xf32> -> vector<8x128xf32>
    %119 = vector.broadcast %115 : vector<1x128xf32> to vector<8x128xf32>
    %120 = arith.addf %118, %119 : vector<8x128xf32>
    %cst_51 = arith.constant 0.000000e+00 : f32
    %121 = vector.broadcast %cst_51 : f32 to vector<8x128xf32>
    %122 = arith.maximumf %120, %121 : vector<8x128xf32>
    %cst_52 = arith.constant 0.000000e+00 : f32
    %123 = vector.shape_cast %2 : vector<8x1xi1> to vector<8x1xi1>
    %124 = vector.broadcast %123 : vector<8x1xi1> to vector<8x128xi1>
    %125 = vector.broadcast %cst_52 : f32 to vector<8x128xf32>
    %126 = arith.select %124, %122, %125 : vector<8x128xi1>, vector<8x128xf32>
    %cst_53 = arith.constant dense<0.000000e+00> : vector<128xf32>
    %127 = vector.multi_reduction <add>, %126, %cst_53 [0] : vector<8x128xf32> to vector<128xf32>
    %128 = vector.shape_cast %127 : vector<128xf32> to vector<1x128xf32>
    %cst_54 = arith.constant 0.166666672 : f32
    %129 = vector.broadcast %cst_54 : f32 to vector<1x128xf32>
    %130 = arith.mulf %128, %129 : vector<1x128xf32>
    %131 = arith.mulf %126, %126 : vector<8x128xf32>
    %cst_55 = arith.constant dense<0.000000e+00> : vector<128xf32>
    %132 = vector.multi_reduction <add>, %131, %cst_55 [0] : vector<8x128xf32> to vector<128xf32>
    %133 = vector.shape_cast %132 : vector<128xf32> to vector<1x128xf32>
    %cst_56 = arith.constant 0.166666672 : f32
    %134 = vector.broadcast %cst_56 : f32 to vector<1x128xf32>
    %135 = arith.mulf %133, %134 : vector<1x128xf32>
    %136 = arith.mulf %130, %130 : vector<1x128xf32>
    %137 = arith.subf %135, %136 : vector<1x128xf32>
    %cst_57 = arith.constant 0.000000e+00 : f32
    %138 = vector.broadcast %cst_57 : f32 to vector<1x128xf32>
    %139 = arith.maximumf %137, %138 : vector<1x128xf32>
    %c10 = arith.constant 10 : index
    %c0_58 = arith.constant 0 : index
    %140 = vector.load %arg2[%c10, %c0_58] : memref<16x128xf32, #tpu.memory_space<vmem>>, vector<1x128xf32>
    %c11 = arith.constant 11 : index
    %c0_59 = arith.constant 0 : index
    %141 = vector.load %arg2[%c11, %c0_59] : memref<16x128xf32, #tpu.memory_space<vmem>>, vector<1x128xf32>
    %cst_60 = arith.constant 9.99999974E-6 : f32
    %142 = vector.broadcast %cst_60 : f32 to vector<1x128xf32>
    %143 = arith.addf %139, %142 : vector<1x128xf32>
    %144 = math.rsqrt %143 : vector<1x128xf32>
    %145 = arith.mulf %140, %144 : vector<1x128xf32>
    %146 = arith.mulf %130, %145 : vector<1x128xf32>
    %147 = arith.subf %141, %146 : vector<1x128xf32>
    %148 = vector.broadcast %145 : vector<1x128xf32> to vector<8x128xf32>
    %149 = arith.mulf %122, %148 : vector<8x128xf32>
    %150 = vector.broadcast %147 : vector<1x128xf32> to vector<8x128xf32>
    %151 = arith.addf %149, %150 : vector<8x128xf32>
    %c12 = arith.constant 12 : index
    %c0_61 = arith.constant 0 : index
    %152 = vector.load %arg2[%c12, %c0_61] : memref<16x128xf32, #tpu.memory_space<vmem>>, vector<1x128xf32>
    %c4_62 = arith.constant 4 : index
    %c0_63 = arith.constant 0 : index
    %c0_64 = arith.constant 0 : index
    %153 = vector.load %arg1[%c4_62, %c0_63, %c0_64] : memref<5x128x128xf32, #tpu.memory_space<vmem>>, vector<1x128x128xf32>
    %154 = vector.shape_cast %153 : vector<1x128x128xf32> to vector<128x128xf32>
    %cst_65 = arith.constant dense<0.000000e+00> : vector<8x128xf32>
    %155 = tpu.matmul %151, %154, %cst_65 {dimension_numbers = #tpu.dot_dimension_numbers<[1], [0], [0], [1], [0, 0, 1, 1], [], []>} : vector<8x128xf32>, vector<128x128xf32>, vector<8x128xf32> -> vector<8x128xf32>
    %156 = vector.broadcast %152 : vector<1x128xf32> to vector<8x128xf32>
    %157 = arith.addf %155, %156 : vector<8x128xf32>
    %c0_66 = arith.constant 0 : index
    %c0_67 = arith.constant 0 : index
    %158 = vector.load %arg3[%c0_66, %c0_67] : memref<8x128xf32, #tpu.memory_space<vmem>>, vector<8x128xf32>
    tpu.vector_store %arg3[%c0_66, %c0_67], %157 {strides = array<i32>} : memref<8x128xf32, #tpu.memory_space<vmem>>, vector<8x128xf32>,
    return
  }
}

</mosaic_0001>

<bundles_post_ra>
// kernel: deep_fc_norm_dqn.1
= control target key start
LH: loop header
LB: loop body
LE: loop exit
PB: predicated region body
PF: predicated region fallthrough
CT: control target
= control target key end

     0   :  { %v1128_v3 = vmov 0.0|0.0   ;;  %vm1129_vm0 = vmmov 0   ;;  %v1130_v6 = vmov 0.0   ;;  %s1518_s0 = inlined_call_operand.vmem [shape: f32[8,128], index: 0, kind: input, shape index: {}]   ;;  %s1519_s1 = inlined_call_operand.vmem [shape: f32[5,128,128], index: 1, kind: input, shape index: {}]   ;;  %s1520_s2 = inlined_call_operand.vmem [shape: f32[16,128], index: 2, kind: input, shape index: {}]   ;;  %s1521_s3 = inlined_call_operand.hbm [shape: f32[8,128], index: 3, kind: output, shape index: {}]  }
   0x1   :  { %v20_v0 = vld [vmem:[%s1519_s1] sm:$0xff]  ;;  %v21_v1 = vld [vmem:[%s1519_s1 + $0x8] sm:$0xff]  ;;  %v22_v2 = vld [vmem:[%s1519_s1 + $0x10] sm:$0xff]  ;;  %972 = vmatprep.subr.bf16.mxu0 %v1128_v3  ;;  %829 = vmatprep.mubr.msk.f32.mxu0 %vm1129_vm0, %v1130_v6 }
   0x2   :  { %v973_v4 = vpack.c.bf16 %v21_v1, %v20_v0  ;;  %v23_v5 = vld [vmem:[%s1519_s1 + $0x18] sm:$0xff]  ;;  %996 = vmatprep.subr.bf16.mxu1 %v1128_v3  ;;  %864 = vmatprep.mubr.msk.f32.mxu1 %vm1129_vm0, %v1130_v6  ;;  %v24_v8 = vld [vmem:[%s1519_s1 + $0x20] sm:$0xff]  ;;  %v25_v9 = vld [vmem:[%s1519_s1 + $0x28] sm:$0xff] }
   0x3   :  { %v976_v7 = vpack.c.bf16 %v23_v5, %v22_v2 }
   0x4   :  { %974 = vmatpush3.bf16.msra.mxu0 %v973_v4 }
   0x5   :  { %975 = vmatprep.subr.bf16.mxu0 %v1128_v3 }
   0x6   :  { %8 = vsyncpa [#allocation3], 0  ;;  %v979_v10 = vpack.c.bf16 %v25_v9, %v24_v8  ;;  %v26_v11 = vld [vmem:[%s1519_s1 + $0x30] sm:$0xff]  ;;  %v27_v12 = vld [vmem:[%s1519_s1 + $0x38] sm:$0xff]  ;;  %v15_v51 = vlaneseq  ;;  %s1131_s4 = smov [#allocation2]  }
   0x7   :  { %v982_v13 = vpack.c.bf16 %v27_v12, %v26_v11  ;;  %v28_v14 = vld [vmem:[%s1519_s1 + $0x40] sm:$0xff]  ;;  %v29_v15 = vld [vmem:[%s1519_s1 + $0x48] sm:$0xff]  ;;  %v30_v17 = vld [vmem:[%s1519_s1 + $0x50] sm:$0xff]  ;;  %s635_s5 = sshll.u32 %s1131_s4, 4  ;;  %s636_s5 = int_to_ptr.vmem [resolvable:$true] %s635_s5 }
   0x8   :  { %977 = vmatpush3.bf16.msra.mxu0 %v976_v7  ;;  %v985_v16 = vpack.c.bf16 %v29_v15, %v28_v14  ;;  %v31_v18 = vld [vmem:[%s1519_s1 + $0x58] sm:$0xff]  ;;  %v32_v20 = vld [vmem:[%s1519_s1 + $0x60] sm:$0xff]  ;;  %v33_v21 = vld [vmem:[%s1519_s1 + $0x68] sm:$0xff]  ;;  %v1275_v52 = vshrl.u32 %v15_v51, 7  ;;  %s1104_s6 = scalar_lea.vmem %s636_s5, 128  ;;  %p1109_p1 = scmp.lt.s32.totalorder %s636_s5, %s636_s5 }
   0x9   :  { %978 = vmatprep.subr.bf16.mxu0 %v1128_v3  ;;  %v988_v19 = vpack.c.bf16 %v31_v18, %v30_v17  ;;  %v991_v22 = vpack.c.bf16 %v33_v21, %v32_v20  ;;  %v34_v23 = vld [vmem:[%s1519_s1 + $0x70] sm:$0xff]  ;;  %v35_v24 = vld [vmem:[%s1519_s1 + $0x78] sm:$0xff]  ;;  %v18_v26 = vld [vmem:[%s1518_s0] sm:$0xff]  ;;  %p1105_p0 = scmp.ne.s32.totalorder %s636_s5, %s1104_s6  ;;  %p1110_p2 = scmp.lt.s32.totalorder %s1104_s6, %s1104_s6 }
   0xa   :  { %v994_v25 = vpack.c.bf16 %v35_v24, %v34_v23  ;;  %v644_v27 = vld [vmem:[%s1519_s1 + $0x80] sm:$0xff]  ;;  %v645_v28 = vld [vmem:[%s1519_s1 + $0x88] sm:$0xff]  ;;  %v646_v30 = vld [vmem:[%s1519_s1 + $0x90] sm:$0xff]  ;;  %vm17_vm1 = vcmp.lt.s32.totalorder %v1275_v52, 6  ;;  %v1287_v17 = vsub.s32 0, %v1275_v52 }
   0xb   :  { %v997_v29 = vpack.c.bf16 %v645_v28, %v644_v27  ;;  %v647_v31 = vld [vmem:[%s1519_s1 + $0x98] sm:$0xff]  ;;  %v648_v33 = vld [vmem:[%s1519_s1 + $0xa0] sm:$0xff]  ;;  %v649_v34 = vld [vmem:[%s1519_s1 + $0xa8] sm:$0xff]  ;;  %p1111_p3 = por %p1110_p2, %p1109_p1 }
   0xc   :  { %980 = vmatpush3.bf16.msra.mxu0 %v979_v10  ;;  %v1000_v32 = vpack.c.bf16 %v647_v31, %v646_v30  ;;  %v1003_v35 = vpack.c.bf16 %v649_v34, %v648_v33  ;;  %v650_v36 = vld [vmem:[%s1519_s1 + $0xb0] sm:$0xff]  ;;  %v651_v37 = vld [vmem:[%s1519_s1 + $0xb8] sm:$0xff]  ;;  %v652_v39 = vld [vmem:[%s1519_s1 + $0xc0] sm:$0xff] }
   0xd   :  { %981 = vmatprep.subr.bf16.mxu0 %v1128_v3  ;;  %998 = vmatpush3.bf16.msra.mxu1 %v997_v29  ;;  %v1006_v38 = vpack.c.bf16 %v651_v37, %v650_v36  ;;  %v653_v40 = vld [vmem:[%s1519_s1 + $0xc8] sm:$0xff]  ;;  %v654_v42 = vld [vmem:[%s1519_s1 + $0xd0] sm:$0xff]  ;;  %v655_v43 = vld [vmem:[%s1519_s1 + $0xd8] sm:$0xff]  ;;  %p1112_p4 = pnand %p1111_p3, %p1105_p0 }
   0xe   :  { %999 = vmatprep.subr.bf16.mxu1 %v1128_v3  ;;  %v1009_v41 = vpack.c.bf16 %v653_v40, %v652_v39  ;;  %v1012_v44 = vpack.c.bf16 %v655_v43, %v654_v42  ;;  %v656_v45 = vld [vmem:[%s1519_s1 + $0xe0] sm:$0xff]  ;;  %v657_v46 = vld [vmem:[%s1519_s1 + $0xe8] sm:$0xff]  ;;  %v658_v48 = vld [vmem:[%s1519_s1 + $0xf0] sm:$0xff] }
   0xf   :  { %v1015_v47 = vpack.c.bf16 %v657_v46, %v656_v45  ;;  %v659_v49 = vld [vmem:[%s1519_s1 + $0xf8] sm:$0xff]  ;;  %v643_v53 = vld [vmem:[%s1520_s2] ss:$0 sm:$0xff]  ;;  %v133_v20 = vld [vmem:[%s1520_s2 + $0x2] sm:$0x1] }
  0x10   :  { %983 = vmatpush3.bf16.msra.mxu0 %v982_v13  ;;  %v1018_v50 = vpack.c.bf16 %v659_v49, %v658_v48  ;;  %v661_v27 = vld [vmem:[%s1519_s1 + $0x100] sm:$0xff]  ;;  %v662_v28 = vld [vmem:[%s1519_s1 + $0x108] sm:$0xff]  ;;  %v663_v30 = vld [vmem:[%s1519_s1 + $0x110] sm:$0xff] }
  0x11   :  { %984 = vmatprep.subr.bf16.mxu0 %v1128_v3  ;;  %1001 = vmatpush3.bf16.msra.mxu1 %v1000_v32  ;;  %v1021_v29 = vpack.c.bf16 %v662_v28, %v661_v27  ;;  %v664_v31 = vld [vmem:[%s1519_s1 + $0x118] sm:$0xff]  ;;  %v665_v33 = vld [vmem:[%s1519_s1 + $0x120] sm:$0xff]  ;;  %v666_v34 = vld [vmem:[%s1519_s1 + $0x128] sm:$0xff] }
  0x12   :  { %1002 = vmatprep.subr.bf16.mxu1 %v1128_v3  ;;  %v1024_v32 = vpack.c.bf16 %v664_v31, %v663_v30  ;;  %v667_v36 = vld [vmem:[%s1519_s1 + $0x130] sm:$0xff]  ;;  %v668_v37 = vld [vmem:[%s1519_s1 + $0x138] sm:$0xff]  ;;  %v669_v39 = vld [vmem:[%s1519_s1 + $0x140] sm:$0xff] }
  0x13   :  { %v670_v40 = vld [vmem:[%s1519_s1 + $0x148] sm:$0xff]  ;;  %v671_v42 = vld [vmem:[%s1519_s1 + $0x150] sm:$0xff]  ;;  %v672_v43 = vld [vmem:[%s1519_s1 + $0x158] sm:$0xff] }
  0x14   :  { %986 = vmatpush3.bf16.msra.mxu0 %v985_v16  ;;  %v132_v16 = vld [vmem:[%s1520_s2 + $0x1] sm:$0x1]  ;;  %v674_v46 = vld [vmem:[%s1519_s1 + $0x168] sm:$0xff]  ;;  %v675_v48 = vld [vmem:[%s1519_s1 + $0x170] sm:$0xff] }
  0x15   :  { %987 = vmatprep.subr.bf16.mxu0 %v1128_v3  ;;  %1004 = vmatpush3.bf16.msra.mxu1 %v1003_v35  ;;  %v1027_v35 = vpack.c.bf16 %v666_v34, %v665_v33  ;;  %v673_v45 = vld [vmem:[%s1519_s1 + $0x160] sm:$0xff]  ;;  %v676_v49 = vld [vmem:[%s1519_s1 + $0x178] sm:$0xff]  ;;  %v679_v27 = vld [vmem:[%s1519_s1 + $0x188] sm:$0xff] }
  0x16   :  { %1005 = vmatprep.subr.bf16.mxu1 %v1128_v3  ;;  %v660_v51 = vld [vmem:[%s1520_s2 + $0x3] ss:$0 sm:$0xff]  ;;  %v684_v34 = vld [vmem:[%s1519_s1 + $0x1b0] sm:$0xff] }
  0x17   :  { %v682_v31 = vld [vmem:[%s1519_s1 + $0x1a0] sm:$0xff] }
  0x18   :  { %989 = vmatpush3.bf16.msra.mxu0 %v988_v19 }
  0x19   :  { %990 = vmatprep.subr.bf16.mxu0 %v1128_v3  ;;  %1007 = vmatpush3.bf16.msra.mxu1 %v1006_v38  ;;  %v1030_v38 = vpack.c.bf16 %v668_v37, %v667_v36  ;;  %v686_v37 = vld [vmem:[%s1519_s1 + $0x1c0] sm:$0xff] }
  0x1a   :  { %1008 = vmatprep.subr.bf16.mxu1 %v1128_v3 }
  0x1c   :  { %992 = vmatpush3.bf16.msra.mxu0 %v991_v22 }
  0x1d   :  { %993 = vmatprep.subr.bf16.mxu0 %v1128_v3  ;;  %1010 = vmatpush3.bf16.msra.mxu1 %v1009_v41  ;;  %v1033_v41 = vpack.c.bf16 %v670_v40, %v669_v39  ;;  %v688_v40 = vld [vmem:[%s1519_s1 + $0x1d0] sm:$0xff] }
  0x1e   :  { %1011 = vmatprep.subr.bf16.mxu1 %v1128_v3 }
  0x20   :  { %995 = vmatpush3.bf16.msra.mxu0 %v994_v25 }
  0x21   :  { %1020 = vmatprep.subr.bf16.mxu0 %v1128_v3  ;;  %1013 = vmatpush3.bf16.msra.mxu1 %v1012_v44  ;;  %v1036_v44 = vpack.c.bf16 %v672_v43, %v671_v42  ;;  %v690_v43 = vld [vmem:[%s1519_s1 + $0x1e0] sm:$0xff] }
  0x22   :  { %1014 = vmatprep.subr.bf16.mxu1 %v1128_v3 }
  0x23   :  { %830 = vmatmul.mubr.f32.vlgmr.msra.gmra.mrb[0].mxu0 %v18_v26 }
  0x24   :  { %899 = vmatprep.mubr.msk.f32.mxu0 %vm1129_vm0, %v1130_v6  ;;  %1022 = vmatpush3.bf16.msra.mxu0 %v1021_v29  ;;  %v680_v29 = vld [vmem:[%s1519_s1 + $0x190] sm:$0xff] }
  0x25   :  { %1016 = vmatpush3.bf16.msra.mxu1 %v1015_v47  ;;  %1023 = vmatprep.subr.bf16.mxu0 %v1128_v3  ;;  %v1039_v47 = vpack.c.bf16 %v674_v46, %v673_v45  ;;  %v692_v46 = vld [vmem:[%s1519_s1 + $0x1f0] sm:$0xff] }
  0x26   :  { %1017 = vmatprep.subr.bf16.mxu1 %v1128_v3 }
  0x28   :  { %1025 = vmatpush3.bf16.msra.mxu0 %v1024_v32  ;;  %v683_v32 = vld [vmem:[%s1519_s1 + $0x1a8] sm:$0xff] }
  0x29   :  { %1019 = vmatpush3.bf16.msra.mxu1 %v1018_v50  ;;  %1026 = vmatprep.subr.bf16.mxu0 %v1128_v3  ;;  %v1042_v50 = vpack.c.bf16 %v676_v49, %v675_v48  ;;  %v1051_v33 = vpack.c.bf16 %v683_v32, %v682_v31  ;;  %v677_v49 = vld [vmem:[%s1520_s2 + $0x6] ss:$0 sm:$0xff]  ;;  %v701_v32 = vld [vmem:[%s1519_s1 + $0x230] sm:$0xff] }
  0x2a   :  { %1044 = vmatprep.subr.bf16.mxu1 %v1128_v3 }
  0x2c   :  { %1028 = vmatpush3.bf16.msra.mxu0 %v1027_v35  ;;  %v685_v35 = vld [vmem:[%s1519_s1 + $0x1b8] sm:$0xff] }
  0x2d   :  { %1029 = vmatprep.subr.bf16.mxu0 %v1128_v3  ;;  %v1054_v36 = vpack.c.bf16 %v685_v35, %v684_v34  ;;  %v703_v35 = vld [vmem:[%s1519_s1 + $0x240] sm:$0xff] }
  0x30   :  { %1031 = vmatpush3.bf16.msra.mxu0 %v1030_v38  ;;  %v687_v38 = vld [vmem:[%s1519_s1 + $0x1c8] sm:$0xff] }
  0x31   :  { %1032 = vmatprep.subr.bf16.mxu0 %v1128_v3  ;;  %v1057_v39 = vpack.c.bf16 %v687_v38, %v686_v37  ;;  %v705_v38 = vld [vmem:[%s1519_s1 + $0x250] sm:$0xff] }
  0x34   :  { %1034 = vmatpush3.bf16.msra.mxu0 %v1033_v41  ;;  %v689_v41 = vld [vmem:[%s1519_s1 + $0x1d8] sm:$0xff] }
  0x35   :  { %1035 = vmatprep.subr.bf16.mxu0 %v1128_v3  ;;  %v1060_v42 = vpack.c.bf16 %v689_v41, %v688_v40  ;;  %v707_v41 = vld [vmem:[%s1519_s1 + $0x260] sm:$0xff] }
  0x38   :  { %1037 = vmatpush3.bf16.msra.mxu0 %v1036_v44  ;;  %v691_v44 = vld [vmem:[%s1519_s1 + $0x1e8] sm:$0xff] }
  0x39   :  { %1038 = vmatprep.subr.bf16.mxu0 %v1128_v3  ;;  %v1063_v45 = vpack.c.bf16 %v691_v44, %v690_v43  ;;  %v709_v44 = vld [vmem:[%s1519_s1 + $0x270] sm:$0xff] }
  0x3c   :  { %1040 = vmatpush3.bf16.msra.mxu0 %v1039_v47  ;;  %v693_v47 = vld [vmem:[%s1519_s1 + $0x1f8] sm:$0xff] }
  0x3d   :  { %1041 = vmatprep.subr.bf16.mxu0 %v1128_v3  ;;  %v1066_v48 = vpack.c.bf16 %v693_v47, %v692_v46  ;;  %v694_v47 = vld [vmem:[%s1520_s2 + $0x9] ss:$0 sm:$0xff] }
  0x40   :  { %1043 = vmatpush3.bf16.msra.mxu0 %v1042_v50 }
  0x41   :  { %1068 = vmatprep.subr.bf16.mxu0 %v1128_v3 }
  0xf6   :  { %v106_v54 = vpop.f32.mrb[0].mxu0 }
  0xf7   :  { %v107_v55 = vadd.f32 %v643_v53, %v106_v54  ;;  %v831_v56 = vpop.f32.mrb[1].mxu0 }
  0xf9   :  { %v110_v57 = vmax.f32 %v107_v55, 0.0 }
  0xfb   :  { %v113_v58 = vsel %vm17_vm1, %v110_v57, 0.0 }
  0xfc   :  { %v114_v59 = vrot.slane %v113_v58, 4  ;;  %v121_v60 = vmul.f32 %v113_v58, %v113_v58 }
  0xfe   :  { %v115_v61 = vadd.f32 %v114_v59, %v113_v58  ;;  %v122_v62 = vrot.slane %v121_v60, 4 }
 0x100   :  { %v116_v63 = vrot.slane %v115_v61, 2  ;;  %v123_v0 = vadd.f32 %v122_v62, %v121_v60 }
 0x102   :  { %v117_v1 = vadd.f32 %v116_v63, %v115_v61  ;;  %v124_v2 = vrot.slane %v123_v0, 2 }
 0x104   :  { %v118_v4 = vrot.slane %v117_v1, 1  ;;  %v125_v5 = vadd.f32 %v124_v2, %v123_v0 }
 0x106   :  { %v119_v7 = vadd.f32 %v118_v4, %v117_v1  ;;  %v126_v8 = vrot.slane %v125_v5, 1 }
 0x108   :  { %v120_v9 = vmul.f32 0.16666667, %v119_v7  ;;  %v127_v10 = vadd.f32 %v126_v8, %v125_v5 }
 0x10a   :  { %v128_v11 = vmul.f32 0.16666667, %v127_v10  ;;  %v129_v12 = vmul.f32 %v120_v9, %v120_v9 }
 0x10c   :  { %v130_v13 = vsub.f32 %v128_v11, %v129_v12 }
 0x10e   :  { %v131_v14 = vmax.f32 %v130_v13, 0.0 }
 0x110   :  { %v134_v15 = vadd.f32 1e-05, %v131_v14 }
 0x112   :  { %1096 = vrsqrt.f32 %v134_v15  ;;  %v261_v15 = vld [vmem:[%s1520_s2 + $0x4] sm:$0x1] }
 0x11c   :  { %v1097_v18 = vpop.eup %1096 }
 0x11d   :  { %v136_v19 = vmul.f32 %v1097_v18, %v132_v16 }
 0x11f   :  { %v137_v21 = vmul.f32 %v136_v19, %v120_v9  ;;  %v142_v22 = vrot.slane %v136_v19, %v1287_v17  ;;  %v262_v19 = vld [vmem:[%s1520_s2 + $0x5] sm:$0x1] }
 0x121   :  { %v138_v23 = vsub.f32 %v133_v20, %v137_v21  ;;  %v143_v24 = vmul.f32 %v142_v22, %v110_v57 }
 0x123   :  { %v147_v25 = vrot.slane %v138_v23, %v1287_v17 }
 0x125   :  { %v148_v26 = vadd.f32 %v147_v25, %v143_v24 }
 0x127   :  { %865 = vmatmul.mubr.f32.vlgmr.msra.gmra.mrb[0].mxu1 %v148_v26  ;;  %v678_v26 = vld [vmem:[%s1519_s1 + $0x180] sm:$0xff] }
 0x128   :  { %934 = vmatprep.mubr.msk.f32.mxu1 %vm1129_vm0, %v1130_v6  ;;  %v1045_v28 = vpack.c.bf16 %v679_v27, %v678_v26  ;;  %v697_v27 = vld [vmem:[%s1519_s1 + $0x210] sm:$0xff] }
 0x12a   :  { %1046 = vmatpush3.bf16.msra.mxu1 %v1045_v28  ;;  %v698_v28 = vld [vmem:[%s1519_s1 + $0x218] sm:$0xff] }
 0x12b   :  { %1047 = vmatprep.subr.bf16.mxu1 %v1128_v3 }
 0x1fa   :  { %v237_v53 = vpop.f32.mrb[0].mxu1 }
 0x1fb   :  { %v238_v54 = vadd.f32 %v660_v51, %v237_v53  ;;  %v866_v55 = vpop.f32.mrb[1].mxu1 }
 0x1fd   :  { %v241_v56 = vmax.f32 %v238_v54, 0.0 }
 0x1ff   :  { %v242_v57 = vsel %vm17_vm1, %v241_v56, 0.0 }
 0x200   :  { %v243_v58 = vrot.slane %v242_v57, 4  ;;  %v250_v59 = vmul.f32 %v242_v57, %v242_v57 }
 0x202   :  { %v244_v60 = vadd.f32 %v243_v58, %v242_v57  ;;  %v251_v61 = vrot.slane %v250_v59, 4 }
 0x204   :  { %v245_v62 = vrot.slane %v244_v60, 2  ;;  %v252_v63 = vadd.f32 %v251_v61, %v250_v59 }
 0x206   :  { %v246_v0 = vadd.f32 %v245_v62, %v244_v60  ;;  %v253_v1 = vrot.slane %v252_v63, 2 }
 0x208   :  { %v247_v2 = vrot.slane %v246_v0, 1  ;;  %v254_v4 = vadd.f32 %v253_v1, %v252_v63 }
 0x20a   :  { %v248_v5 = vadd.f32 %v247_v2, %v246_v0  ;;  %v255_v7 = vrot.slane %v254_v4, 1 }
 0x20c   :  { %v249_v8 = vmul.f32 0.16666667, %v248_v5  ;;  %v256_v9 = vadd.f32 %v255_v7, %v254_v4 }
 0x20e   :  { %v257_v10 = vmul.f32 0.16666667, %v256_v9  ;;  %v258_v11 = vmul.f32 %v249_v8, %v249_v8 }
 0x210   :  { %v259_v12 = vsub.f32 %v257_v10, %v258_v11 }
 0x212   :  { %v260_v13 = vmax.f32 %v259_v12, 0.0 }
 0x214   :  { %v263_v14 = vadd.f32 1e-05, %v260_v13  ;;  %v390_v13 = vld [vmem:[%s1520_s2 + $0x7] sm:$0x1] }
 0x216   :  { %1098 = vrsqrt.f32 %v263_v14 }
 0x220   :  { %v1099_v16 = vpop.eup %1098 }
 0x221   :  { %v265_v18 = vmul.f32 %v1099_v16, %v261_v15  ;;  %v391_v16 = vld [vmem:[%s1520_s2 + $0x8] sm:$0x1] }
 0x223   :  { %v266_v20 = vmul.f32 %v265_v18, %v249_v8  ;;  %v271_v21 = vrot.slane %v265_v18, %v1287_v17 }
 0x225   :  { %v267_v22 = vsub.f32 %v262_v19, %v266_v20  ;;  %v272_v23 = vmul.f32 %v271_v21, %v241_v56 }
 0x227   :  { %v276_v24 = vrot.slane %v267_v22, %v1287_v17 }
 0x229   :  { %v277_v25 = vadd.f32 %v276_v24, %v272_v23  ;;  %v695_v24 = vld [vmem:[%s1519_s1 + $0x200] sm:$0xff] }
 0x22b   :  { %900 = vmatmul.mubr.f32.vlgmr.msra.gmra.mrb[2].mxu0 %v277_v25  ;;  %v696_v25 = vld [vmem:[%s1519_s1 + $0x208] sm:$0xff] }
 0x22c   :  { %969 = vmatprep.mubr.msk.f32.mxu0 %vm1129_vm0, %v1130_v6  ;;  %v681_v6 = vld [vmem:[%s1519_s1 + $0x198] sm:$0xff]  ;;  %v1069_v26 = vpack.c.bf16 %v696_v25, %v695_v24 }
 0x22d   :  { %v1048_v30 = vpack.c.bf16 %v681_v6, %v680_v29  ;;  %v1072_v29 = vpack.c.bf16 %v698_v28, %v697_v27  ;;  %v699_v6 = vld [vmem:[%s1519_s1 + $0x220] sm:$0xff] }
 0x22e   :  { %1070 = vmatpush3.bf16.msra.mxu0 %v1069_v26 }
 0x22f   :  { %1049 = vmatpush3.bf16.msra.mxu1 %v1048_v30  ;;  %1071 = vmatprep.subr.bf16.mxu0 %v1128_v3  ;;  %v700_v30 = vld [vmem:[%s1519_s1 + $0x228] sm:$0xff] }
 0x230   :  { %1050 = vmatprep.subr.bf16.mxu1 %v1128_v3  ;;  %v1075_v31 = vpack.c.bf16 %v700_v30, %v699_v6 }
 0x232   :  { %1073 = vmatpush3.bf16.msra.mxu0 %v1072_v29 }
 0x233   :  { %1052 = vmatpush3.bf16.msra.mxu1 %v1051_v33  ;;  %1074 = vmatprep.subr.bf16.mxu0 %v1128_v3  ;;  %v702_v33 = vld [vmem:[%s1519_s1 + $0x238] sm:$0xff] }
 0x234   :  { %1053 = vmatprep.subr.bf16.mxu1 %v1128_v3  ;;  %v1078_v34 = vpack.c.bf16 %v702_v33, %v701_v32 }
 0x236   :  { %1076 = vmatpush3.bf16.msra.mxu0 %v1075_v31 }
 0x237   :  { %1055 = vmatpush3.bf16.msra.mxu1 %v1054_v36  ;;  %1077 = vmatprep.subr.bf16.mxu0 %v1128_v3  ;;  %v704_v36 = vld [vmem:[%s1519_s1 + $0x248] sm:$0xff] }
 0x238   :  { %1056 = vmatprep.subr.bf16.mxu1 %v1128_v3  ;;  %v1081_v37 = vpack.c.bf16 %v704_v36, %v703_v35 }
 0x23a   :  { %1079 = vmatpush3.bf16.msra.mxu0 %v1078_v34 }
 0x23b   :  { %1058 = vmatpush3.bf16.msra.mxu1 %v1057_v39  ;;  %1080 = vmatprep.subr.bf16.mxu0 %v1128_v3  ;;  %v706_v39 = vld [vmem:[%s1519_s1 + $0x258] sm:$0xff] }
 0x23c   :  { %1059 = vmatprep.subr.bf16.mxu1 %v1128_v3  ;;  %v1084_v40 = vpack.c.bf16 %v706_v39, %v705_v38 }
 0x23e   :  { %1082 = vmatpush3.bf16.msra.mxu0 %v1081_v37 }
 0x23f   :  { %1061 = vmatpush3.bf16.msra.mxu1 %v1060_v42  ;;  %1083 = vmatprep.subr.bf16.mxu0 %v1128_v3  ;;  %v708_v42 = vld [vmem:[%s1519_s1 + $0x268] sm:$0xff] }
 0x240   :  { %1062 = vmatprep.subr.bf16.mxu1 %v1128_v3  ;;  %v1087_v43 = vpack.c.bf16 %v708_v42, %v707_v41 }
 0x242   :  { %1085 = vmatpush3.bf16.msra.mxu0 %v1084_v40 }
 0x243   :  { %1064 = vmatpush3.bf16.msra.mxu1 %v1063_v45  ;;  %1086 = vmatprep.subr.bf16.mxu0 %v1128_v3  ;;  %v710_v45 = vld [vmem:[%s1519_s1 + $0x278] sm:$0xff] }
 0x244   :  { %1065 = vmatprep.subr.bf16.mxu1 %v1128_v3  ;;  %v1090_v46 = vpack.c.bf16 %v710_v45, %v709_v44 }
 0x246   :  { %1088 = vmatpush3.bf16.msra.mxu0 %v1087_v43 }
 0x247   :  { %1067 = vmatpush3.bf16.msra.mxu1 %v1066_v48  ;;  %1089 = vmatprep.subr.bf16.mxu0 %v1128_v3 }
 0x24a   :  { %1091 = vmatpush3.bf16.msra.mxu0 %v1090_v46 }
 0x2fe   :  { %v366_v50 = vpop.f32.mrb[2].mxu0 }
 0x2ff   :  { %v367_v51 = vadd.f32 %v677_v49, %v366_v50  ;;  %v901_v53 = vpop.f32.mrb[3].mxu0 }
 0x301   :  { %v370_v54 = vmax.f32 %v367_v51, 0.0 }
 0x303   :  { %v371_v55 = vsel %vm17_vm1, %v370_v54, 0.0 }
 0x304   :  { %v372_v56 = vrot.slane %v371_v55, 4  ;;  %v379_v57 = vmul.f32 %v371_v55, %v371_v55 }
 0x306   :  { %v373_v58 = vadd.f32 %v372_v56, %v371_v55  ;;  %v380_v59 = vrot.slane %v379_v57, 4 }
 0x308   :  { %v374_v60 = vrot.slane %v373_v58, 2  ;;  %v381_v61 = vadd.f32 %v380_v59, %v379_v57 }
 0x30a   :  { %v375_v62 = vadd.f32 %v374_v60, %v373_v58  ;;  %v382_v63 = vrot.slane %v381_v61, 2 }
 0x30c   :  { %v376_v0 = vrot.slane %v375_v62, 1  ;;  %v383_v1 = vadd.f32 %v382_v63, %v381_v61 }
 0x30e   :  { %v377_v2 = vadd.f32 %v376_v0, %v375_v62  ;;  %v384_v4 = vrot.slane %v383_v1, 1 }
 0x310   :  { %v378_v5 = vmul.f32 0.16666667, %v377_v2  ;;  %v385_v7 = vadd.f32 %v384_v4, %v383_v1 }
 0x312   :  { %v386_v8 = vmul.f32 0.16666667, %v385_v7  ;;  %v387_v9 = vmul.f32 %v378_v5, %v378_v5 }
 0x314   :  { %v388_v10 = vsub.f32 %v386_v8, %v387_v9  ;;  %v519_v9 = vld [vmem:[%s1520_s2 + $0xa] sm:$0x1] }
 0x316   :  { %v389_v11 = vmax.f32 %v388_v10, 0.0 }
 0x318   :  { %v392_v12 = vadd.f32 1e-05, %v389_v11 }
 0x31a   :  { %1100 = vrsqrt.f32 %v392_v12  ;;  %v520_v12 = vld [vmem:[%s1520_s2 + $0xb] sm:$0x1] }
 0x324   :  { %v1101_v14 = vpop.eup %1100 }
 0x325   :  { %v394_v15 = vmul.f32 %v1101_v14, %v390_v13 }
 0x327   :  { %v395_v18 = vmul.f32 %v394_v15, %v378_v5  ;;  %v400_v19 = vrot.slane %v394_v15, %v1287_v17 }
 0x329   :  { %v396_v20 = vsub.f32 %v391_v16, %v395_v18  ;;  %v401_v21 = vmul.f32 %v400_v19, %v370_v54 }
 0x32b   :  { %v405_v22 = vrot.slane %v396_v20, %v1287_v17  ;;  %v711_v20 = vld [vmem:[%s1520_s2 + $0xc] ss:$0 sm:$0xff] }
 0x32d   :  { %v406_v23 = vadd.f32 %v405_v22, %v401_v21 }
 0x32f   :  { %935 = vmatmul.mubr.f32.vlgmr.msra.gmra.mrb[2].mxu1 %v406_v23 }
 0x402   :  { %v495_v48 = vpop.f32.mrb[2].mxu1 }
 0x403   :  { %v496_v49 = vadd.f32 %v694_v47, %v495_v48  ;;  %v936_v50 = vpop.f32.mrb[3].mxu1 }
 0x405   :  { %v499_v51 = vmax.f32 %v496_v49, 0.0 }
 0x407   :  { %v500_v3 = vsel %vm17_vm1, %v499_v51, 0.0 }
 0x408   :  { %v501_v53 = vrot.slane %v500_v3, 4  ;;  %v508_v54 = vmul.f32 %v500_v3, %v500_v3 }
 0x40a   :  { %v502_v55 = vadd.f32 %v501_v53, %v500_v3  ;;  %v509_v56 = vrot.slane %v508_v54, 4 }
 0x40c   :  { %v503_v57 = vrot.slane %v502_v55, 2  ;;  %v510_v58 = vadd.f32 %v509_v56, %v508_v54 }
 0x40e   :  { %v504_v59 = vadd.f32 %v503_v57, %v502_v55  ;;  %v511_v60 = vrot.slane %v510_v58, 2 }
 0x410   :  { %v505_v61 = vrot.slane %v504_v59, 1  ;;  %v512_v62 = vadd.f32 %v511_v60, %v510_v58 }
 0x412   :  { %v506_v63 = vadd.f32 %v505_v61, %v504_v59  ;;  %v513_v0 = vrot.slane %v512_v62, 1 }
 0x414   :  { %v507_v1 = vmul.f32 0.16666667, %v506_v63  ;;  %v514_v2 = vadd.f32 %v513_v0, %v512_v62 }
 0x416   :  { %v515_v4 = vmul.f32 0.16666667, %v514_v2  ;;  %v516_v5 = vmul.f32 %v507_v1, %v507_v1 }
 0x418   :  { %v517_v7 = vsub.f32 %v515_v4, %v516_v5 }
 0x41a   :  { %v518_v8 = vmax.f32 %v517_v7, 0.0 }
 0x41c   :  { %v521_v52 = vadd.f32 1e-05, %v518_v8 }
 0x41e   :  { %1102 = vrsqrt.f32 %v521_v52 }
 0x428   :  { %v1103_v10 = vpop.eup %1102 }
 0x429   :  { %v523_v11 = vmul.f32 %v1103_v10, %v519_v9 }
 0x42b   :  { %v524_v13 = vmul.f32 %v523_v11, %v507_v1  ;;  %v529_v14 = vrot.slane %v523_v11, %v1287_v17 }
 0x42d   :  { %v525_v15 = vsub.f32 %v520_v12, %v524_v13  ;;  %v530_v16 = vmul.f32 %v529_v14, %v499_v51 }
 0x42f   :  { %v534_v18 = vrot.slane %v525_v15, %v1287_v17 }
 0x431   :  { %v535_v19 = vadd.f32 %v534_v18, %v530_v16 }
 0x433   :  { %970 = vmatmul.mubr.f32.vlgmr.msra.gmra.mrb[4].mxu0 %v535_v19 }
 0x506   :  { %v624_v21 = vpop.f32.mrb[4].mxu0 }
 0x507   :  { %v625_v22 = vadd.f32 %v711_v20, %v624_v21  ;;  %v971_v23 = vpop.f32.mrb[5].mxu0 }
 0x509   :  { %628 = vst [vmem:[#allocation2] sm:$0xff] %v625_v22 }
 0x50a   :  { %1115 = shalt.err (!%p1112_p4)
}
 0x50b   :  { %s1116_s9 = scalar_lea.hbm %s1521_s3, 128 }
 0x50c   :  { %p1117_p5 = scmp.ne.s32.totalorder %s1521_s3, %s1116_s9  ;;  %p1120_p6 = scmp.lt.u32.totalorder %s1116_s9, %s1521_s3 }
 0x50e   :  { %p1122_p7 = pnand %p1120_p6, %p1117_p5 }
 0x510   :  { %1125 = shalt.err (!%p1122_p7)
}
 0x511   :  { %638 = dma.vmem_to_hbm [thread:$0]  %s636_s5, 128, %s1521_s3, [#allocation3]  }
 0x512   :  { %1126 = dma.done.wait [#allocation3], 128  }
 0x513   :  { %1127 = vsyncadd [#allocation3], 4294967168 }
 0x514   :  { %642 = vsyncpa [#allocation3], 1 }

</bundles_post_ra>
